<compile_context>
chip_gen: v6e
topology: v6e:2x2x1
jax: 0.10.0
libtpu: 0.0.40
codegen_flags: <defaults>
</compile_context>

<pallas_src>
import functools

import jax
import jax.numpy as jnp
from jax.experimental import pallas as pl
from jax.experimental.pallas import tpu as pltpu

_MIB = 1024 * 1024
_VMEM_BUDGET = 36 * _MIB  # practical resident budget (safe for v7x 64 MiB physical)


def _round_up(x, m):
    return ((x + m - 1) // m) * m


# ---------------------------------------------------------------------------
# Fused kernel: LayerNorm-normalize (affine pre-folded) -> bf16 matmul (f32 acc)
#               -> + bias -> ReLU.
# ---------------------------------------------------------------------------
def _ln_linear_relu_kernel(x_ref, w_ref, b_ref, o_ref, *,
                           eps, apply_ln, apply_relu, mxu_dtype):
    # x_ref: (TM, D)   w_ref: (D, TN) bf16 (gamma already folded in)
    # b_ref: (1, TN) f32 (beta @ W^T + b already folded in)   o_ref: (TM, TN)
    x = x_ref[...].astype(jnp.float32)
    if apply_ln:
        inv_d = 1.0 / x.shape[-1]
        s1 = jnp.sum(x, axis=-1, keepdims=True)          # single pass over x:
        s2 = jnp.sum(x * x, axis=-1, keepdims=True)       # sum and sum-of-squares
        mean = s1 * inv_d
        var = jnp.maximum(s2 * inv_d - mean * mean, 0.0)  # biased variance, clamped
        x = (x - mean) * jax.lax.rsqrt(var + eps)         # EUP rsqrt (free slot)
    # Dropout (eval mode) is the identity.
    y = jnp.dot(x.astype(mxu_dtype), w_ref[...],
                preferred_element_type=jnp.float32)        # bf16 MXU feed, f32 acc
    y = y + b_ref[...]
    if apply_relu:
        y = jnp.maximum(y, 0.0)
    o_ref[...] = y.astype(o_ref.dtype)


# ---------------------------------------------------------------------------
# One-time parameter preparation (hoisted out of the forward pass).
# ---------------------------------------------------------------------------
def prepare_linear_layer_params(params, *, layer_norm=True, mxu_dtype=jnp.bfloat16):
    gamma, beta, w, b = params            # gamma/beta: (D,)  w: (out, in)  b: (out,)
    n_out, d_in = w.shape
    n_pad = _round_up(n_out, 128)         # lane-dense output stores

    w_t = w.astype(jnp.float32).T         # (in, out): feeds the MXU without .T
    if layer_norm:
        # Fold the LN affine into the linear layer (exact in f32):
        #   LN(x) @ W^T + b = xhat @ (diag(gamma) W^T) + (beta @ W^T + b)
        w_t = gamma.astype(jnp.float32)[:, None] * w_t
        b_eff = b.astype(jnp.float32) + beta.astype(jnp.float32) @ w.astype(jnp.float32).T
    else:
        b_eff = b.astype(jnp.float32)

    w_prep = jnp.zeros((d_in, n_pad), mxu_dtype).at[:, :n_out].set(w_t.astype(mxu_dtype))
    b_prep = jnp.zeros((1, n_pad), jnp.float32).at[0, :n_out].set(b_eff)
    return w_prep, b_prep, n_out


# ---------------------------------------------------------------------------
# Tile selection: >=2 row-grid steps when possible (v7x megacore), VMEM budget aware.
# ---------------------------------------------------------------------------
def _choose_tiles(M, D, n_pad):
    # N tile: keep the whole weight resident unless its double-buffered bf16 slab
    # exceeds ~half the resident budget; then halve (multiple of 128).
    tn = n_pad
    while tn > 128 and 2 * D * tn * 2 > _VMEM_BUDGET // 2:
        tn = max(128, _round_up(tn // 2, 128))
    # Row tile: multiple of 8, <= 512, aim for >= 2 grid steps over M.
    if M > 8:
        tm = min(512, _round_up(pl.cdiv(M, 2), 8))
    else:
        tm = 8
    # Shrink rows until double-buffered x / out tiles fit the remaining budget.
    while tm > 8 and 2 * tm * (D * 4 + tn * 4) > _VMEM_BUDGET // 2:
        tm = max(8, _round_up(tm // 2, 8))
    return tm, tn


# ---------------------------------------------------------------------------
# Forward wrapper: layout plumbing only (flatten rows, tile, slice padding off).
# ---------------------------------------------------------------------------
def linear_layer_forward(prepared, x, *, layer_norm=True, relu=True, eps=1e-5):
    w_prep, b_prep, n_out = prepared
    d_in, n_pad = w_prep.shape
    lead_shape = x.shape[:-1]
    assert x.shape[-1] == d_in

    x2d = x.reshape(-1, d_in)
    M = x2d.shape[0]

    tm, tn = _choose_tiles(M, d_in, n_pad)
    grid = (pl.cdiv(M, tm), pl.cdiv(n_pad, tn))   # partial last row tile is masked

    # Explicit scoped-VMEM limit sized from the chosen tiles (+ intermediates).
    need = (2 * tm * d_in * x2d.dtype.itemsize        # x tiles (double-buffered)
            + 2 * d_in * tn * w_prep.dtype.itemsize   # weight slabs
            + 2 * tn * 4                              # bias
            + 2 * tm * tn * x.dtype.itemsize          # out tiles
            + tm * d_in * 4 + tm * tn * 4)            # in-kernel intermediates
    vmem_limit = int(min(max(need * 2, 32 * _MIB), 64 * _MIB))

    kernel = functools.partial(_ln_linear_relu_kernel, eps=eps,
                               apply_ln=layer_norm, apply_relu=relu,
                               mxu_dtype=w_prep.dtype)

    out = pl.pallas_call(
        kernel,
        out_shape=jax.ShapeDtypeStruct((M, n_pad), x.dtype),
        grid=grid,
        in_specs=[
            pl.BlockSpec((tm, d_in), lambda i, j: (i, 0)),  # x: row tiles (resident over j)
            pl.BlockSpec((d_in, tn), lambda i, j: (0, j)),  # folded W^T (bf16)
            pl.BlockSpec((1, tn), lambda i, j: (0, j)),     # folded bias (f32)
        ],
        out_specs=pl.BlockSpec((tm, tn), lambda i, j: (i, j)),
        compiler_params=pltpu.CompilerParams(
            dimension_semantics=("parallel", "parallel"),
            vmem_limit_bytes=vmem_limit),
    )(x2d, w_prep, b_prep)

    if n_pad != n_out:
        out = out[:, :n_out]
    return out.reshape(*lead_shape, n_out)


# ---------------------------------------------------------------------------
# Deterministic parameter init (torch.nn.Linear-style bounds; LN params randomized
# slightly so the LayerNorm scale/shift fold is actually exercised).
# ---------------------------------------------------------------------------
def init_linear_layer_params(key, in_hsz, out_hsz):
    key, kg, kbt, kw, kb = jax.random.split(key, 5)
    gamma = 1.0 + 0.1 * jax.random.normal(kg, (in_hsz,), jnp.float32)
    beta = 0.1 * jax.random.normal(kbt, (in_hsz,), jnp.float32)
    bound = 1.0 / jnp.sqrt(jnp.float32(in_hsz))
    w = jax.random.uniform(kw, (out_hsz, in_hsz), jnp.float32, -bound, bound)
    b = jax.random.uniform(kb, (out_hsz,), jnp.float32, -bound, bound)
    return (gamma, beta, w, b)


# Pure-JAX f32 reference (eval-mode dropout = identity), for sanity checking.
def linear_layer_reference(params, x, *, layer_norm=True, relu=True, eps=1e-5):
    gamma, beta, w, b = params
    if layer_norm:
        mean = jnp.mean(x, axis=-1, keepdims=True)
        var = jnp.mean((x - mean) ** 2, axis=-1, keepdims=True)
        x = (x - mean) * jax.lax.rsqrt(var + eps) * gamma + beta
    y = x @ w.T + b
    if relu:
        y = jnp.maximum(y, 0.0)
    return y


if __name__ == "__main__":
    batch, seq, in_hsz, out_hsz = 2, 8, 32, 16

    key = jax.random.PRNGKey(0)
    key, kx = jax.random.split(key)
    x = jax.random.normal(kx, (batch, seq, in_hsz), jnp.float32)

    params = init_linear_layer_params(key, in_hsz, out_hsz)

    # One-time param prep (weight transpose + lane-pad + LN-affine fold + bf16 cast),
    # hoisted out of the per-call forward path.
    prepared = prepare_linear_layer_params(params, layer_norm=True)

    out = linear_layer_forward(prepared, x, layer_norm=True, relu=True)
    out = jax.block_until_ready(out)

    ref = linear_layer_reference(params, x, layer_norm=True, relu=True)
    assert out.shape == (batch, seq, out_hsz), out.shape
    max_err = float(jnp.max(jnp.abs(out - ref)))
    # bf16 MXU feed with f32 accumulation: loosen tolerance vs the pure-f32 reference.
    assert jnp.allclose(out, ref, atol=3e-2, rtol=3e-2), f"mismatch vs reference, max_err={max_err}"

    print("KERNEL_OK")
</pallas_src>

<mosaic_0001>
module attributes {stable_mosaic.version = 11 : i64} {
  func.func @_ln_linear_relu_kernel(%arg0: i32, %arg1: i32, %arg2: memref<8x32xf32, #tpu.memory_space<vmem>>, %arg3: memref<32x128xbf16, #tpu.memory_space<vmem>>, %arg4: memref<1x128xf32, #tpu.memory_space<vmem>>, %arg5: memref<8x128xf32, #tpu.memory_space<vmem>>) attributes {dimension_semantics = [#tpu.dimension_semantics<parallel>, #tpu.dimension_semantics<parallel>], iteration_bounds = array<i64: 2, 1>, scalar_prefetch = 0 : i64, scratch_operands = 0 : i64, tpu.core_type = #tpu.core_type<tc>, window_params = [{transform_indices = @transform_0, window_bounds = array<i64: 8, 32>}, {transform_indices = @transform_1, window_bounds = array<i64: 32, 128>}, {transform_indices = @transform_2, window_bounds = array<i64: 1, 128>}, {transform_indices = @transform_3, window_bounds = array<i64: 8, 128>}]} {
    %c0 = arith.constant 0 : index
    %c0_0 = arith.constant 0 : index
    %0 = vector.load %arg2[%c0, %c0_0] : memref<8x32xf32, #tpu.memory_space<vmem>>, vector<8x32xf32>
    %cst = arith.constant dense<0.000000e+00> : vector<8xf32>
    %1 = vector.multi_reduction <add>, %0, %cst [1] : vector<8x32xf32> to vector<8xf32>
    %2 = vector.shape_cast %1 : vector<8xf32> to vector<8x1xf32>
    %3 = arith.mulf %0, %0 : vector<8x32xf32>
    %cst_1 = arith.constant dense<0.000000e+00> : vector<8xf32>
    %4 = vector.multi_reduction <add>, %3, %cst_1 [1] : vector<8x32xf32> to vector<8xf32>
    %5 = vector.shape_cast %4 : vector<8xf32> to vector<8x1xf32>
    %cst_2 = arith.constant 3.125000e-02 : f32
    %6 = vector.broadcast %cst_2 : f32 to vector<8x1xf32>
    %7 = arith.mulf %2, %6 : vector<8x1xf32>
    %cst_3 = arith.constant 3.125000e-02 : f32
    %8 = vector.broadcast %cst_3 : f32 to vector<8x1xf32>
    %9 = arith.mulf %5, %8 : vector<8x1xf32>
    %10 = arith.mulf %7, %7 : vector<8x1xf32>
    %11 = arith.subf %9, %10 : vector<8x1xf32>
    %cst_4 = arith.constant 0.000000e+00 : f32
    %12 = vector.broadcast %cst_4 : f32 to vector<8x1xf32>
    %13 = arith.maximumf %11, %12 : vector<8x1xf32>
    %14 = vector.broadcast %7 : vector<8x1xf32> to vector<8x32xf32>
    %15 = arith.subf %0, %14 : vector<8x32xf32>
    %cst_5 = arith.constant 9.99999974E-6 : f32
    %16 = vector.broadcast %cst_5 : f32 to vector<8x1xf32>
    %17 = arith.addf %13, %16 : vector<8x1xf32>
    %18 = math.rsqrt %17 : vector<8x1xf32>
    %19 = vector.broadcast %18 : vector<8x1xf32> to vector<8x32xf32>
    %20 = arith.mulf %15, %19 : vector<8x32xf32>
    %21 = arith.truncf %20 : vector<8x32xf32> to vector<8x32xbf16>
    %c0_6 = arith.constant 0 : index
    %c0_7 = arith.constant 0 : index
    %22 = vector.load %arg3[%c0_6, %c0_7] : memref<32x128xbf16, #tpu.memory_space<vmem>>, vector<32x128xbf16>
    %cst_8 = arith.constant dense<0.000000e+00> : vector<8x128xf32>
    %23 = tpu.matmul %21, %22, %cst_8 {dimension_numbers = #tpu.dot_dimension_numbers<[1], [0], [0], [1], [0, 0, 1, 1], [], []>} : vector<8x32xbf16>, vector<32x128xbf16>, vector<8x128xf32> -> vector<8x128xf32>
    %c0_9 = arith.constant 0 : index
    %c0_10 = arith.constant 0 : index
    %24 = vector.load %arg4[%c0_9, %c0_10] : memref<1x128xf32, #tpu.memory_space<vmem>>, vector<1x128xf32>
    %25 = vector.broadcast %24 : vector<1x128xf32> to vector<8x128xf32>
    %26 = arith.addf %23, %25 : vector<8x128xf32>
    %cst_11 = arith.constant 0.000000e+00 : f32
    %27 = vector.broadcast %cst_11 : f32 to vector<8x128xf32>
    %28 = arith.maximumf %26, %27 : vector<8x128xf32>
    %c0_12 = arith.constant 0 : index
    %c0_13 = arith.constant 0 : index
    %29 = vector.load %arg5[%c0_12, %c0_13] : memref<8x128xf32, #tpu.memory_space<vmem>>, vector<8x128xf32>
    tpu.vector_store %arg5[%c0_12, %c0_13], %28 {strides = array<i32>} : memref<8x128xf32, #tpu.memory_space<vmem>>, vector<8x128xf32>,
    return
  }
  func.func @transform_0(%arg0: i32, %arg1: i32) -> (i32, i32) {
    %c0_i32 = arith.constant 0 : i32
    %c0_i32_0 = arith.constant 0 : i32
    return %arg0, %c0_i32 : i32, i32
  }
  func.func @transform_1(%arg0: i32, %arg1: i32) -> (i32, i32) {
    %c0_i32 = arith.constant 0 : i32
    %c0_i32_0 = arith.constant 0 : i32
    return %c0_i32, %arg1 : i32, i32
  }
  func.func @transform_2(%arg0: i32, %arg1: i32) -> (i32, i32) {
    %c0_i32 = arith.constant 0 : i32
    %c0_i32_0 = arith.constant 0 : i32
    return %c0_i32, %arg1 : i32, i32
  }
  func.func @transform_3(%arg0: i32, %arg1: i32) -> (i32, i32) {
    %c0_i32 = arith.constant 0 : i32
    return %arg0, %arg1 : i32, i32
  }
}

</mosaic_0001>

<bundles_post_ra>
// kernel: tpu_custom_call.1
= control target key start
LH: loop header
LB: loop body
LE: loop exit
PB: predicated region body
PF: predicated region fallthrough
CT: control target
= control target key end

     0   :  { %8 = vsyncpa [#allocation3], 0  ;;  %s910_s0 = inlined_call_operand.hbm [shape: f32[16,32], index: 0, kind: input, shape index: {}]   ;;  %s911_s1 = inlined_call_operand.hbm [shape: bf16[32,128], index: 1, kind: input, shape index: {}]   ;;  %s912_s2 = inlined_call_operand.vmem [shape: f32[1,128], index: 2, kind: input, shape index: {}]   ;;  %s913_s3 = inlined_call_operand.hbm [shape: f32[16,128], index: 3, kind: output, shape index: {}]  }
   0x1   :  { %10 = vsyncpa [#allocation3 + $0x1], 0 }
   0x2   :  { %11 = vsyncpa [#allocation6], 0 }
   0x3   :  { %12 = vsyncpa [#allocation4], 0 }
   0x4   :  { %14 = vsyncpa [#allocation4 + $0x1], 0  ;;  %s721_s12 = smov 0   ;;  %s723_s13 = smov 0  }
   0x5   :  { %s725_s14 = smov 0   ;;  %s727_s15 = smov 0  }
   0x6   :  { %s729_s16 = smov 0   ;;  %s731_s17 = smov 0  }
   0x7 LB: > { %s442_s18 = sadd.s32 4294967295, %s692_s17   ;;  %s443_s19 = sadd.s32 4294967294, %s692_s17   ;;  %s692_s17 = sphi %s731_s17, %s20_s17   ;;  %s688_s16 = sphi %s729_s16, %s931_s16   ;;  %s684_s15 = sphi %s727_s15, %s930_s15   ;;  %s680_s14 = sphi %s725_s14, %s929_s14   ;;  %s676_s13 = sphi %s723_s13, %s928_s13   ;;  %s672_s12 = sphi %s721_s12, %s927_s12  }
   0x8   : > { %p52_p0 = scmp.ne.s32.totalorder %s676_s13, %s672_s12  ;;  %p755_p1 = scmp.eq.s32.totalorder %s442_s18, 0 }
   0x9   : > { %p759_p2 = scmp.eq.s32.totalorder %s442_s18, 1  ;;  %p136_p3 = scmp.eq.s32.totalorder %s443_s19, 1 }
   0xa   : > { %p765_p4 = por %p755_p1, %p52_p0  ;;  %p444_p5 = scmp.ge.s32.totalorder %s692_s17, 1 }
   0xb   : > { %p770_p6 = por %p136_p3, %p52_p0  ;;  %p143_p7 = scmp.lt.s32.totalorder %s692_s17, 3 }
   0xc   : > { %s917_s22 = scalar_select %p765_p4, 1, 0 }
   0xd   : > { %s918_s23 = scalar_select %p770_p6, 1, 0 }
   0xe   : > { %p775_p8 = pnand %p444_p5, %p143_p7  ;;  %s694_s25 = smov [#allocation5]  }
   0xf   : > { %s157_s26 = sshll.u32 %s694_s25, 4  ;;  %s32_s28 = sadd.s32 1, %s688_s16  ;;  %s158_s26 = int_to_ptr.vmem [resolvable:$true] %s157_s26 }
  0x10   : > { %p481_p9 = pneg %p775_p8  ;;  %s565_s29 = scalar_lea.vmem %s158_s26, 256 }
  0x11   : > { %p566_p13 = scmp.ne.s32.totalorder %s158_s26, %s565_s29  ;;  %p573_p5 = scmp.lt.s32.totalorder %s158_s26, %s158_s26 }
  0x12   : > { %p784_p11 = pnand %p481_p9, %p755_p1  ;;  %p574_p7 = scmp.lt.s32.totalorder %s565_s29, %s565_s29 }
  0x14   : > { %p556_p12 = pneg %p784_p11  ;;  %p575_p6 = por %p574_p7, %p573_p5 }
  0x16   : > { %p568_p0 = pnand %p566_p13, %p556_p12 }
  0x18   : > { %p569_p3 = pneg %p568_p0 }
  0x1a   : > { %p576_p4 = pnand %p575_p6, %p569_p3 }
  0x1c   : > { %579 = shalt.err (!%p576_p4)
}
  0x1d   : > { %s695_s30 = smov 64   ;;  %s696_s4 = smov 4  }
  0x1e   : > { %484 = dma.hbm_to_vmem [thread:$0]  (!%p784_p11), %s911_s1, 256, %s158_s26, [#allocation6], %s695_s30, %s695_s30, %s696_s4  }
  0x1f   : > { %p34_p6 = scmp.ge.s32.totalorder %s32_s28, 2  ;;  %s39_s7 = sadd.s32 1, %s680_s14 }
  0x20   : > { %p46_p4 = scmp.ne.s32.totalorder %s680_s14, %s676_s13  ;;  %p47_p9 = scmp.eq.s32.totalorder %s692_s17, 0 }
  0x21   : > { %s933_s28 = smov (%p34_p6, %s32_s28), 0  ;;  %p494_p0 = scmp.lt.s32.totalorder %s692_s17, 2 }
  0x22   : > { %p802_p12 = por %p47_p9, %p46_p4  ;;  %p808_p13 = por %p759_p2, %p46_p4 }
  0x23   : > { %s36_s10 = ssub.s32 %s688_s16, %s933_s28  ;;  %s177_s11 = sand.u32 1, %s680_s14  }
  0x24   : > { %p37_p11 = scmp.eq.s32.totalorder %s36_s10, 0  ;;  %s448_s18 = sshll.u32 %s177_s11, 3 }
  0x25   : > { %s449_s25 = sshll.u32 %s688_s16, 7  ;;  %s181_s30 = scalar_lea.vmem [#allocation2], %s448_s18 }
  0x26   : > { %s817_s19 = scalar_select %p37_p11, %s680_s14, %s39_s7  }
  0x27   : > { %s186_s29 = scalar_lea.hbm %s910_s0, %s449_s25  ;;  %s188_s4 = sshll.u32 %s181_s30, 4  ;;  %s189_s4 = int_to_ptr.vmem [resolvable:$true] %s188_s4 }
  0x28   : > { %p825_p2 = pnand %p494_p0, %p802_p12  ;;  %s178_s5 = scalar_lea.sflag [#allocation3], %s177_s11 }
  0x29   : > { %s593_s6 = scalar_lea.vmem %s189_s4, 128  ;;  %s697_s7 = smov [#allocation2]  }
  0x2a   : > { %p582_p3 = pneg %p825_p2  ;;  %p594_p5 = scmp.ne.s32.totalorder %s189_s4, %s593_s6 }
  0x2b   : > { %s598_s10 = sshll.u32 %s697_s7, 4  ;;  %s599_s10 = int_to_ptr.vmem [resolvable:$false] %s598_s10 }
  0x2c   : > { %p596_p7 = pnand %p594_p5, %p582_p3  ;;  %s600_s25 = scalar_lea.vmem %s599_s10, 256 }
  0x2d   : > { %p601_p4 = scmp.lt.s32.totalorder %s189_s4, %s599_s10  ;;  %p602_p9 = scmp.lt.s32.totalorder %s600_s25, %s593_s6 }
  0x2e   : > { %p597_p6 = pneg %p596_p7 }
  0x2f   : > { %p603_p11 = por %p602_p9, %p601_p4 }
  0x31   : > { %p604_p10 = pnand %p603_p11, %p597_p6 }
  0x33   : > { %607 = shalt.err (!%p604_p10)
}
  0x34   : > { %488 = dma.hbm_to_vmem [thread:$0]  (!%p825_p2), %s186_s29, 128, %s189_s4, %s178_s5  }
  0x35   : > { %197 = sbr.rel (%p775_p8) target bundleno = 442 (0x1ba), region = 32  ;;  %s836_s8 = sand.u32 (!%p775_p8), 1, %s676_s13  }
  0x36   : > { %s451_s11 = sshll.u32 (!%p775_p8), %s836_s8, 3  ;;  %s200_s18 = scalar_lea.sflag (!%p775_p8), [#allocation3], %s836_s8 }
  0x37   : > { %s203_s26 = scalar_lea.vmem (!%p775_p8), [#allocation2], %s451_s11  ;;  %p924_p12 = scmp.ne.s32.totalorder (!%p775_p8), %s917_s22, 0 }
  0x3a   : > { %659 = dma.done.wait (%p924_p12), %s200_s18, 128  }
  0x3b   : > { %661 = vsyncadd (%p924_p12), %s200_s18, 4294967168 }
  0x3c   : > { %663 = dma.done.wait (%p755_p1), [#allocation6], 256  }
  0x3d   : > { %665 = vsyncadd (%p755_p1), [#allocation6], 4294967040  ;;  %vm238_vm0 = vcmask 261120   ;;  %v237_v0 = vld [vmem:[%s203_s26] sm:$0xff]  ;;  %v550_v4 = vld [vmem:[#allocation5 + $0x8] sm:$0xff]   ;;  %v698_v5 = vmov 0.0  }
  0x3e   : > { %v239_v1 = vsel %vm238_vm0, %v237_v0, 0.0  ;;  %v242_v2 = vmul.f32 %v237_v0, %v237_v0  ;;  %465 = vmatprep.subr.bf16.mxu0 %v698_v5  ;;  %vm699_vm1 = vmmov 0   ;;  %v551_v6 = vld [vmem:[#allocation5] sm:$0xff]   ;;  %v454_v19 = vld [vmem:[%s912_s2] ss:$0 sm:$0xff]  ;;  %s459_s24 = sshll.u32 %s684_s15, 7 }
  0x3f   : > { %240 = vadd.xlane.f32.xlu0 %v239_v1  ;;  %469 = vmatprep.mubr.msk.bf16.mxu0 %vm699_vm1, %v698_v5  ;;  %s232_s27 = scalar_lea.vmem [#allocation7], %s451_s11  ;;  %s862_s21 = scalar_lea.hbm %s913_s3, %s459_s24 }
  0x40   : > { %v243_v3 = vsel %vm238_vm0, %v242_v2, 0.0  ;;  %466 = vmatpush3.bf16.msra.mxu0 %v550_v4  ;;  %s339_s29 = sshll.u32 %s232_s27, 4  ;;  %s325_s15 = scalar_lea.sflag [#allocation4], %s836_s8  ;;  %s864_s29 = int_to_ptr.vmem [resolvable:$true] %s339_s29 }
  0x41   : > { %467 = vmatprep.subr.bf16.mxu0 %v698_v5  ;;  %s608_s5 = scalar_lea.vmem %s864_s29, 128  ;;  %s700_s6 = smov [#allocation7]  }
  0x42   : > { %p609_p1 = scmp.ne.s32.totalorder %s864_s29, %s608_s5  ;;  %s612_s7 = sshll.u32 %s700_s6, 4  ;;  %s613_s7 = int_to_ptr.vmem [resolvable:$false] %s612_s7 }
  0x43   : > { %244 = vadd.xlane.f32.xlu0 %v243_v3  ;;  %s614_s10 = scalar_lea.vmem %s613_s7, 256  ;;  %p615_p0 = scmp.lt.s32.totalorder %s864_s29, %s613_s7 }
  0x44   : > { %468 = vmatpush3.bf16.msra.mxu0 %v551_v6  ;;  %p610_p8 = pnand %p609_p1, %p808_p13  ;;  %p616_p2 = scmp.lt.s32.totalorder %s614_s10, %s608_s5 }
  0x46   : > { %p611_p10 = pneg %p610_p8  ;;  %p617_p3 = por %p616_p2, %p615_p0 }
  0x48   : > { %p618_p5 = pnand %p617_p3, %p611_p10 }
  0xc8   : > { %v241_v7 = vpop.xlane.xlu0 %240 }
  0xc9   : > { %v246_v8 = vmul.f32 0.03125, %v241_v7 }
  0xcb   : > { %v248_v10 = vmul.f32 %v246_v8, %v246_v8  ;;  %v251_v15 = vsub.f32 %v237_v0, %v246_v8 }
  0xcc   : > { %v245_v9 = vpop.xlane.xlu0 %244 }
  0xcd   : > { %v247_v11 = vmul.f32 0.03125, %v245_v9 }
  0xcf   : > { %v249_v12 = vsub.f32 %v247_v11, %v248_v10 }
  0xd1   : > { %v250_v13 = vmax.f32 %v249_v12, 0.0 }
  0xd3   : > { %v252_v14 = vadd.f32 1e-05, %v250_v13 }
  0xd5   : > { %552 = vrsqrt.f32 %v252_v14 }
  0xe2   : > { %v553_v16 = vpop.eup %552 }
  0xe3   : > { %v254_v17 = vmul.f32 %v553_v16, %v251_v15 }
  0xe5   : > { %v255_v18 = vpack.c.bf16 %v254_v17, %v254_v17 }
  0xe7   : > { %470 = vmatmul.mubr.msk.bf16.vlgmr.msra.gmra.mxu0 %vm238_vm0, %v255_v18 }
 0x1a7   : > { %v316_v20 = vpop.f32.mrf.mxu0 }
 0x1a8   : > { %v317_v21 = vadd.f32 %v454_v19, %v316_v20 }
 0x1a9   : > { %v471_v22 = vpop.f32.mrf.mxu0 }
 0x1aa   : > { %v322_v23 = vmax.f32 %v317_v21, 0.0 }
 0x1ab   : > { %v319_v24 = vpop.f32.mrf.mxu0 }
 0x1ac   : > { %323 = vst [vmem:[%s232_s27] sm:$0xff] %v322_v23 }
 0x1ad   : > { %v472_v25 = vpop.f32.mrf.mxu0 }
 0x1ae   : > { %621 = shalt.err (!%p618_p5)
}
 0x1af   : > { %s622_s25 = scalar_lea.hbm %s862_s21, 128  ;;  %s626_s18 = scalar_lea.hbm %s913_s3, 256 }
 0x1b0   : > { %p623_p7 = scmp.ne.s32.totalorder %s862_s21, %s622_s25  ;;  %p627_p9 = scmp.lt.s32.totalorder %s862_s21, %s913_s3 }
 0x1b1   : > { %p628_p11 = scmp.lt.s32.totalorder %s626_s18, %s622_s25 }
 0x1b2   : > { %p624_p6 = pnand %p623_p7, %p808_p13 }
 0x1b3   : > { %p629_p12 = por %p628_p11, %p627_p9 }
 0x1b4   : > { %p625_p4 = pneg %p624_p6 }
 0x1b6   : > { %p630_p1 = pnand %p629_p12, %p625_p4 }
 0x1b8   : > { %633 = shalt.err (!%p630_p1)
}
 0x1b9   : > { %479 = dma.vmem_to_hbm [thread:$0]  (%p808_p13), %s864_s29, 128, %s862_s21, %s325_s15  }
 0x1ba PF: > { %s351_s22 = sand.u32 1, %s672_s12   ;;  %p925_p8 = scmp.ne.s32.totalorder %s918_s23, 0 }
 0x1bb   : > { %p926_p10 = scmp.ge.s32.totalorder %s692_s17, 2  ;;  %s352_s24 = scalar_lea.sflag [#allocation4], %s351_s22 }
 0x1bd   : > { %p490_p0 = pnand %p926_p10, %p925_p8 }
 0x1bf   : > { %p491_p2 = pneg %p490_p0 }
 0x1c1   : > { %667 = dma.done.wait (%p491_p2), %s352_s24, 128  }
 0x1c2   : > { %669 = vsyncadd (%p491_p2), %s352_s24, 4294967168  ;;  %s20_s17 = sadd.s32 1, %s692_s17   ;;  %s927_s12 = smov %s676_s13 }
 0x1c3   : > { %p17_p3 = scmp.ge.s32.totalorder %s20_s17, 4   ;;  %s928_s13 = smov %s680_s14 }
 0x1c4   : > { %s929_s14 = smov %s817_s19  ;;  %s930_s15 = smov %s688_s16 }
 0x1c5   : > { %s931_s16 = smov %s933_s28  ;;  %19 = sbr.rel (!%p17_p3) target bundleno = 7 (0x7), region = 85 }
 0x1ca   :  { %357 = vsyncpa [#allocation3], 1 }
 0x1cb   :  { %359 = vsyncpa [#allocation3 + $0x1], 1 }
 0x1cc   :  { %360 = vsyncpa [#allocation6], 1 }
 0x1cd   :  { %361 = vsyncpa [#allocation4], 1 }
 0x1ce   :  { %363 = vsyncpa [#allocation4 + $0x1], 1 }

</bundles_post_ra>
